<compile_context>
chip_gen: v5e
topology: v5e:2x2
jax: 0.10.0
libtpu: 0.0.40
codegen_flags: <defaults>
</compile_context>

<pallas_src>
import functools

import jax
import jax.numpy as jnp
from jax import lax
from jax.experimental import pallas as pl
from jax.experimental.pallas import tpu as pltpu


def _cdiv(a, b):
    return (a + b - 1) // b


def _distill_reg_kernel(s_ref, t_ref, o_ref, acc_ref, *,
                        factor, inv_temp, n_classes, n_rows, block_rows):
    c = pl.program_id(0)            # per-TensorCore partial (parallel axis)
    i = pl.program_id(1)            # batch block within this core (arbitrary axis)
    nb = pl.num_programs(1)

    @pl.when(i == 0)
    def _init():
        acc_ref[...] = jnp.zeros_like(acc_ref)

    s = s_ref[...].astype(jnp.float32)      # (TB, C)
    t = t_ref[...].astype(jnp.float32)

    def temp_softmax(x):
        # softmax(x / T) == renormalised softmax(x)^(1/T): one exp per element,
        # no log/exp temperature chain, numerically stable.
        m = jnp.max(x, axis=1, keepdims=True)
        e = jnp.exp((x - m) * inv_temp)
        denom = jnp.sum(e, axis=1, keepdims=True)           # (TB, 1)
        r = pl.reciprocal(denom, approx=True)               # EUP vrcp (per row)
        r = r * (2.0 - denom * r)                           # 1 Newton step -> f32 accuracy
        return e * r

    p_s = temp_softmax(s)
    p_t = temp_softmax(t)

    # Student + eps/C, renormalised.  The denominator is analytically 1 + 1e-5
    # (softmax already sums to 1), so no extra row reduction / divide.
    y_s = (p_s + (1e-5 / n_classes)) * (1.0 / (1.0 + 1e-5))
    ce = -jnp.sum(p_t * jnp.log(y_s), axis=1, keepdims=True)  # (TB, 1)

    # Mask rows past the real batch (partial tail block and surplus blocks of
    # this core); jnp.where blocks any NaN/Inf from padded rows.
    row0 = (c * nb + i) * block_rows
    rows = row0 + lax.broadcasted_iota(jnp.int32, ce.shape, 0)
    ce = jnp.where(rows < n_rows, ce, 0.0)

    acc_ref[...] += jnp.sum(ce, axis=0, keepdims=True)

    @pl.when(i == nb - 1)
    def _finalize():
        o_ref[0] = acc_ref[...] * (factor / n_rows)


def _default_block_rows(batch, n_classes):
    # ~10 live f32 copies of a (TB, C) tile (2 double-buffered input streams +
    # compute temporaries); keep that under ~16 MiB so the tile fits the scoped
    # VMEM limit on every generation, including v7x's 64 MiB per-core VMEM.
    budget = 16 * 1024 * 1024
    tb = budget // (n_classes * 4 * 10)
    tb = max(8, min(1024, (tb // 8) * 8))
    return min(tb, _cdiv(batch, 8) * 8)


def distill_reg(y_student, y_teacher, factor: float, temp: float, *, block_rows=None):
    """Pallas implementation of DistillReg.forward. Returns a scalar."""
    assert y_student.shape == y_teacher.shape and y_student.ndim == 2
    B, C = y_student.shape

    tb = (_default_block_rows(B, C) if block_rows is None
          else max(8, _cdiv(int(block_rows), 8) * 8))
    n_blocks = _cdiv(B, tb)                    # real batch blocks
    n_cores = 2 if n_blocks >= 2 else 1        # v7x: one partial per TensorCore
    nb = _cdiv(n_blocks, n_cores)              # blocks per core
    last_block = n_blocks - 1

    kernel = functools.partial(
        _distill_reg_kernel,
        factor=float(factor),
        inv_temp=1.0 / float(temp),
        n_classes=float(C),
        n_rows=B,
        block_rows=tb,
    )

    def in_map(c, i):
        # Clamp surplus trailing blocks to the last real block (their rows are
        # masked in-kernel) so the input DMA never goes out of bounds.
        return (jnp.minimum(c * nb + i, last_block), 0)

    partials = pl.pallas_call(
        kernel,
        out_shape=jax.ShapeDtypeStruct((n_cores, 1, 1), jnp.float32),
        grid_spec=pltpu.PrefetchScalarGridSpec(
            num_scalar_prefetch=0,
            grid=(n_cores, nb),
            in_specs=[
                pl.BlockSpec((tb, C), in_map),
                pl.BlockSpec((tb, C), in_map),
            ],
            out_specs=pl.BlockSpec((1, 1, 1), lambda c, i: (c, 0, 0)),
            scratch_shapes=[pltpu.VMEM((1, 1), jnp.float32)],
        ),
        compiler_params=pltpu.CompilerParams(
            dimension_semantics=("parallel", "arbitrary"),
            vmem_limit_bytes=40 * 1024 * 1024,
        ),
    )(y_student, y_teacher)

    return jnp.sum(partials)


def _distill_reg_ref(y_student, y_teacher, factor, temp):
    """Pure-JAX reference mirroring the PyTorch forward step-by-step."""
    ys = jax.nn.softmax(y_student.astype(jnp.float32), axis=1)
    yt = jax.nn.softmax(y_teacher.astype(jnp.float32), axis=1)
    ys = ys ** (1.0 / temp)
    yt = yt ** (1.0 / temp)
    ys = ys / jnp.sum(ys, axis=1, keepdims=True)
    yt = yt / jnp.sum(yt, axis=1, keepdims=True)
    ys = ys + 1e-05 / ys.shape[1]
    ys = ys / jnp.sum(ys, axis=1, keepdims=True)
    ce = -(yt * jnp.log(ys)).sum(axis=1)
    return factor * ce.mean()


if __name__ == "__main__":
    factor = 0.5
    temp = 4.0

    B, C = 52, 128   # small logits; C=128 keeps the class axis lane-aligned
    key = jax.random.PRNGKey(0)
    k1, k2 = jax.random.split(key)
    y_student = jax.random.normal(k1, (B, C), dtype=jnp.float32)
    y_teacher = jax.random.normal(k2, (B, C), dtype=jnp.float32)

    ref = _distill_reg_ref(y_student, y_teacher, factor, temp)

    # Multi-block path: grid (2, 2), partial tail block masked (rows 52..63).
    out_tiled = distill_reg(y_student, y_teacher, factor, temp, block_rows=16)
    out_tiled = jax.block_until_ready(out_tiled)
    assert jnp.allclose(out_tiled, ref, rtol=5e-5, atol=1e-5), (out_tiled, ref)

    # Default auto-sized tile path (single block here).
    out_auto = distill_reg(y_student, y_teacher, factor, temp)
    out_auto = jax.block_until_ready(out_auto)
    assert jnp.allclose(out_auto, ref, rtol=5e-5, atol=1e-5), (out_auto, ref)

    print("KERNEL_OK")
</pallas_src>

<mosaic_0001>
module attributes {stable_mosaic.version = 11 : i64} {
  func.func @_distill_reg_kernel(%arg0: i32, %arg1: i32, %arg2: memref<16x128xf32, #tpu.memory_space<vmem>>, %arg3: memref<16x128xf32, #tpu.memory_space<vmem>>, %arg4: memref<1x1x1xf32, #tpu.memory_space<vmem>>, %arg5: memref<1x1xf32, #tpu.memory_space<vmem>>) attributes {dimension_semantics = [#tpu.dimension_semantics<parallel>, #tpu.dimension_semantics<arbitrary>], iteration_bounds = array<i64: 2, 2>, scalar_prefetch = 0 : i64, scratch_operands = 1 : i64, tpu.core_type = #tpu.core_type<tc>, window_params = [{transform_indices = @transform_0, window_bounds = array<i64: 16, 128>}, {transform_indices = @transform_1, window_bounds = array<i64: 16, 128>}, {transform_indices = @transform_2, window_bounds = array<i64: 1, 1, 1>}]} {
    %c0_i32 = arith.constant 0 : i32
    %0 = arith.cmpi eq, %arg1, %c0_i32 : i32
    %1 = arith.extui %0 : i1 to i32
    %c0_i32_0 = arith.constant 0 : i32
    %2 = arith.cmpi ne, %1, %c0_i32_0 : i32
    scf.if %2 {
      %cst_22 = arith.constant 0.000000e+00 : f32
      %65 = vector.broadcast %cst_22 : f32 to vector<1x1xf32>
      %c0_23 = arith.constant 0 : index
      %c0_24 = arith.constant 0 : index
      %66 = vector.load %arg5[%c0_23, %c0_24] : memref<1x1xf32, #tpu.memory_space<vmem>>, vector<1x1xf32>
      tpu.vector_store %arg5[%c0_23, %c0_24], %65 {strides = array<i32>} : memref<1x1xf32, #tpu.memory_space<vmem>>, vector<1x1xf32>,
    } else {
    }
    %c0 = arith.constant 0 : index
    %c0_1 = arith.constant 0 : index
    %3 = vector.load %arg2[%c0, %c0_1] : memref<16x128xf32, #tpu.memory_space<vmem>>, vector<16x128xf32>
    %c0_2 = arith.constant 0 : index
    %c0_3 = arith.constant 0 : index
    %4 = vector.load %arg3[%c0_2, %c0_3] : memref<16x128xf32, #tpu.memory_space<vmem>>, vector<16x128xf32>
    %cst = arith.constant dense<0xFF800000> : vector<16xf32>
    %5 = vector.multi_reduction <maximumf>, %3, %cst [1] : vector<16x128xf32> to vector<16xf32>
    %6 = vector.shape_cast %5 : vector<16xf32> to vector<16x1xf32>
    %7 = vector.broadcast %6 : vector<16x1xf32> to vector<16x128xf32>
    %8 = arith.subf %3, %7 : vector<16x128xf32>
    %cst_4 = arith.constant 2.500000e-01 : f32
    %9 = vector.broadcast %cst_4 : f32 to vector<16x128xf32>
    %10 = arith.mulf %8, %9 : vector<16x128xf32>
    %11 = math.exp %10 : vector<16x128xf32>
    %cst_5 = arith.constant dense<0.000000e+00> : vector<16xf32>
    %12 = vector.multi_reduction <add>, %11, %cst_5 [1] : vector<16x128xf32> to vector<16xf32>
    %13 = vector.shape_cast %12 : vector<16xf32> to vector<16x1xf32>
    %14 = tpu.reciprocal %13 {approx = true} : vector<16x1xf32> -> vector<16x1xf32>
    %15 = arith.mulf %13, %14 : vector<16x1xf32>
    %cst_6 = arith.constant 2.000000e+00 : f32
    %16 = vector.broadcast %cst_6 : f32 to vector<16x1xf32>
    %17 = arith.subf %16, %15 : vector<16x1xf32>
    %18 = arith.mulf %14, %17 : vector<16x1xf32>
    %19 = vector.broadcast %18 : vector<16x1xf32> to vector<16x128xf32>
    %20 = arith.mulf %11, %19 : vector<16x128xf32>
    %cst_7 = arith.constant dense<0xFF800000> : vector<16xf32>
    %21 = vector.multi_reduction <maximumf>, %4, %cst_7 [1] : vector<16x128xf32> to vector<16xf32>
    %22 = vector.shape_cast %21 : vector<16xf32> to vector<16x1xf32>
    %23 = vector.broadcast %22 : vector<16x1xf32> to vector<16x128xf32>
    %24 = arith.subf %4, %23 : vector<16x128xf32>
    %cst_8 = arith.constant 2.500000e-01 : f32
    %25 = vector.broadcast %cst_8 : f32 to vector<16x128xf32>
    %26 = arith.mulf %24, %25 : vector<16x128xf32>
    %27 = math.exp %26 : vector<16x128xf32>
    %cst_9 = arith.constant dense<0.000000e+00> : vector<16xf32>
    %28 = vector.multi_reduction <add>, %27, %cst_9 [1] : vector<16x128xf32> to vector<16xf32>
    %29 = vector.shape_cast %28 : vector<16xf32> to vector<16x1xf32>
    %30 = tpu.reciprocal %29 {approx = true} : vector<16x1xf32> -> vector<16x1xf32>
    %31 = arith.mulf %29, %30 : vector<16x1xf32>
    %cst_10 = arith.constant 2.000000e+00 : f32
    %32 = vector.broadcast %cst_10 : f32 to vector<16x1xf32>
    %33 = arith.subf %32, %31 : vector<16x1xf32>
    %34 = arith.mulf %30, %33 : vector<16x1xf32>
    %35 = vector.broadcast %34 : vector<16x1xf32> to vector<16x128xf32>
    %36 = arith.mulf %27, %35 : vector<16x128xf32>
    %cst_11 = arith.constant 7.812500e-08 : f32
    %37 = vector.broadcast %cst_11 : f32 to vector<16x128xf32>
    %38 = arith.addf %20, %37 : vector<16x128xf32>
    %cst_12 = arith.constant 0.999989986 : f32
    %39 = vector.broadcast %cst_12 : f32 to vector<16x128xf32>
    %40 = arith.mulf %38, %39 : vector<16x128xf32>
    %41 = math.log %40 : vector<16x128xf32>
    %42 = arith.mulf %36, %41 : vector<16x128xf32>
    %cst_13 = arith.constant dense<0.000000e+00> : vector<16xf32>
    %43 = vector.multi_reduction <add>, %42, %cst_13 [1] : vector<16x128xf32> to vector<16xf32>
    %44 = vector.shape_cast %43 : vector<16xf32> to vector<16x1xf32>
    %cst_14 = arith.constant 0.000000e+00 : f32
    %45 = vector.broadcast %cst_14 : f32 to vector<16x1xf32>
    %46 = arith.subf %45, %44 : vector<16x1xf32>
    %c2_i32 = arith.constant 2 : i32
    %47 = arith.muli %arg0, %c2_i32 : i32
    %48 = arith.addi %47, %arg1 : i32
    %c16_i32 = arith.constant 16 : i32
    %49 = arith.muli %48, %c16_i32 : i32
    %50 = tpu.iota {dimensions = array<i32: 0>} : vector<16x1xi32>
    %51 = vector.broadcast %49 : i32 to vector<16x1xi32>
    %52 = arith.addi %51, %50 : vector<16x1xi32>
    %c52_i32 = arith.constant 52 : i32
    %53 = vector.broadcast %c52_i32 : i32 to vector<16x1xi32>
    %54 = arith.cmpi slt, %52, %53 : vector<16x1xi32>
    %cst_15 = arith.constant 0.000000e+00 : f32
    %55 = vector.broadcast %cst_15 : f32 to vector<16x1xf32>
    %56 = arith.select %54, %46, %55 : vector<16x1xi1>, vector<16x1xf32>
    %c0_16 = arith.constant 0 : index
    %c0_17 = arith.constant 0 : index
    %57 = vector.load %arg5[%c0_16, %c0_17] : memref<1x1xf32, #tpu.memory_space<vmem>>, vector<1x1xf32>
    %cst_18 = arith.constant dense<0.000000e+00> : vector<1xf32>
    %58 = vector.multi_reduction <add>, %56, %cst_18 [0] : vector<16x1xf32> to vector<1xf32>
    %59 = vector.shape_cast %58 : vector<1xf32> to vector<1x1xf32>
    %60 = arith.addf %57, %59 : vector<1x1xf32>
    %c0_19 = arith.constant 0 : index
    %c0_20 = arith.constant 0 : index
    %61 = vector.load %arg5[%c0_19, %c0_20] : memref<1x1xf32, #tpu.memory_space<vmem>>, vector<1x1xf32>
    tpu.vector_store %arg5[%c0_19, %c0_20], %60 {strides = array<i32>} : memref<1x1xf32, #tpu.memory_space<vmem>>, vector<1x1xf32>,
    %c1_i32 = arith.constant 1 : i32
    %62 = arith.cmpi eq, %arg1, %c1_i32 : i32
    %63 = arith.extui %62 : i1 to i32
    %c0_i32_21 = arith.constant 0 : i32
    %64 = arith.cmpi ne, %63, %c0_i32_21 : i32
    scf.if %64 {
      %c0_22 = arith.constant 0 : index
      %c0_23 = arith.constant 0 : index
      %65 = vector.load %arg5[%c0_22, %c0_23] : memref<1x1xf32, #tpu.memory_space<vmem>>, vector<1x1xf32>
      %cst_24 = arith.constant 0.00961538497 : f32
      %66 = vector.broadcast %cst_24 : f32 to vector<1x1xf32>
      %67 = arith.mulf %65, %66 : vector<1x1xf32>
      %c0_25 = arith.constant 0 : index
      %c0_26 = arith.constant 0 : index
      %c0_27 = arith.constant 0 : index
      %68 = vector.load %arg4[%c0_25, %c0_26, %c0_27] : memref<1x1x1xf32, #tpu.memory_space<vmem>>, vector<1x1x1xf32>
      %69 = vector.shape_cast %68 : vector<1x1x1xf32> to vector<1x1xf32>
      %70 = vector.shape_cast %67 : vector<1x1xf32> to vector<1x1x1xf32>
      tpu.vector_store %arg4[%c0_25, %c0_26, %c0_27], %70 {strides = array<i32>} : memref<1x1x1xf32, #tpu.memory_space<vmem>>, vector<1x1x1xf32>,
    } else {
    }
    return
  }
  func.func @transform_0(%arg0: i32, %arg1: i32) -> (i32, i32) {
    %c2_i32 = arith.constant 2 : i32
    %0 = arith.muli %arg0, %c2_i32 : i32
    %1 = arith.addi %0, %arg1 : i32
    %c3_i32 = arith.constant 3 : i32
    %2 = arith.minsi %1, %c3_i32 : i32
    %c0_i32 = arith.constant 0 : i32
    %c0_i32_0 = arith.constant 0 : i32
    return %2, %c0_i32 : i32, i32
  }
  func.func @transform_1(%arg0: i32, %arg1: i32) -> (i32, i32) {
    %c2_i32 = arith.constant 2 : i32
    %0 = arith.muli %arg0, %c2_i32 : i32
    %1 = arith.addi %0, %arg1 : i32
    %c3_i32 = arith.constant 3 : i32
    %2 = arith.minsi %1, %c3_i32 : i32
    %c0_i32 = arith.constant 0 : i32
    %c0_i32_0 = arith.constant 0 : i32
    return %2, %c0_i32 : i32, i32
  }
  func.func @transform_2(%arg0: i32, %arg1: i32) -> (i32, i32, i32) {
    %c0_i32 = arith.constant 0 : i32
    %c0_i32_0 = arith.constant 0 : i32
    %c0_i32_1 = arith.constant 0 : i32
    return %arg0, %c0_i32, %c0_i32_0 : i32, i32, i32
  }
}

</mosaic_0001>

<bundles_post_ra>
// kernel: tpu_custom_call.1
= control target key start
LH: loop header
LB: loop body
LE: loop exit
PB: predicated region body
PF: predicated region fallthrough
CT: control target
= control target key end

     0   :  { %7 = vsyncpa [#allocation4], 0  ;;  %s982_s0 = inlined_call_operand.hbm [shape: f32[52,128], index: 0, kind: input, shape index: {}]   ;;  %s983_s1 = inlined_call_operand.hbm [shape: f32[52,128], index: 1, kind: input, shape index: {}]   ;;  %s984_s2 = inlined_call_operand.vmem [shape: f32[2,1,1], index: 2, kind: output, shape index: {}]  }
   0x1   :  { %9 = vsyncpa [#allocation4 + $0x1], 0 }
   0x2   :  { %10 = vsyncpa [#allocation6], 0 }
   0x3   :  { %12 = vsyncpa [#allocation6 + $0x1], 0  ;;  %s772_s9 = smov 0   ;;  %s774_s10 = smov 0  }
   0x4   :  { %s776_s11 = smov 0   ;;  %s778_s12 = smov 0  }
   0x5   :  { %s780_s13 = smov 0   ;;  %s782_s14 = smov 0  }
   0x6   :  { %s784_s15 = smov 0   ;;  %s786_s16 = smov 0  }
   0x7 LB: > { %s27_s17 = sadd.s32 1, %s740_s14  ;;  %s30_s18 = sadd.s32 1, %s744_s15  ;;  %s748_s16 = sphi %s786_s16, %s18_s16   ;;  %s744_s15 = sphi %s784_s15, %s995_s15   ;;  %s740_s14 = sphi %s782_s14, %s994_s14   ;;  %s736_s13 = sphi %s780_s13, %s993_s13   ;;  %s732_s12 = sphi %s778_s12, %s992_s12   ;;  %s728_s11 = sphi %s776_s11, %s991_s11   ;;  %s724_s10 = sphi %s774_s10, %s990_s10   ;;  %s720_s9 = sphi %s772_s9, %s989_s9  }
   0x8   : > { %p28_p0 = scmp.ge.s32.totalorder %s27_s17, 2  ;;  %s474_s19 = sadd.s32 4294967295, %s748_s16  }
   0x9   : > { %s476_s20 = sshll.u32 %s744_s15, 1  ;;  %p52_p1 = scmp.ne.s32.totalorder %s728_s11, %s724_s10 }
   0xa   : > { %s997_s17 = smov (%p28_p0, %s27_s17), 0  ;;  %s999_s18 = smov (!%p28_p0, %s30_s18), %s744_s15 }
   0xb   : > { %s35_s21 = sadd.s32 %s740_s14, %s476_s20  ;;  %p32_p2 = scmp.ge.s32.totalorder %s999_s18, 2 }
   0xc   : > { %p36_p3 = scmp.lt.s32.totalorder %s35_s21, 3  ;;  %p53_p4 = scmp.eq.s32.totalorder %s748_s16, 0 }
   0xd   : > { %p58_p5 = scmp.ne.s32.totalorder %s724_s10, %s720_s9  ;;  %s1001_s18 = smov (%p32_p2, %s999_s18), 0 }
   0xe   : > { %s1003_s21 = smov (!%p36_p3, %s35_s21), 3  ;;  %s477_s22 = sshll.u32 %s1001_s18, 1 }
   0xf   : > { %p827_p6 = por %p53_p4, %p52_p1  ;;  %s39_s24 = sadd.s32 %s477_s22, %s997_s17 }
  0x10   : > { %p59_p7 = scmp.eq.s32.totalorder %s474_s19, 0  ;;  %p40_p8 = scmp.lt.s32.totalorder %s39_s24, 3 }
  0x11   : > { %s45_s27 = sadd.s32 1, %s728_s11  ;;  %p481_p11 = scmp.ge.s32.totalorder %s748_s16, 4 }
  0x12   : > { %p832_p9 = por %p59_p7, %p58_p5  ;;  %s1005_s24 = smov (!%p40_p8, %s39_s24), 3 }
  0x13   : > { %s42_s26 = ssub.s32 %s1003_s21, %s1005_s24  ;;  %138 = sbr.rel (%p481_p11) target bundleno = 96 (0x60), region = 16 }
  0x14   : > { %p43_p10 = scmp.eq.s32.totalorder %s42_s26, 0 }
  0x16   : > { %s839_s28 = scalar_select %p43_p10, %s728_s11, %s45_s27  }
  0x18   : > { %141 = sbr.rel (!%p827_p6) target bundleno = 60 (0x3c), region = 20  ;;  %s142_s29 = sand.u32 (%p827_p6), 1, %s728_s11  }
  0x19   : > { %s484_s30 = sshll.u32 (%p827_p6), %s1003_s21, 1  ;;  %s482_s3 = sshll.u32 (%p827_p6), %s142_s29, 4 }
  0x1a   : > { %s152_s4 = ssub.s32 (%p827_p6), 7, %s484_s30  ;;  %s849_s8 = scalar_lea.sflag (%p827_p6), [#allocation4], %s142_s29 }
  0x1b   : > { %p153_p12 = scmp.lt.s32.totalorder (%p827_p6), %s152_s4, 2  ;;  %s146_s9 = scalar_lea.vmem (%p827_p6), [#allocation3], %s482_s3 }
  0x1d   : > { %s1007_s4 = smov (!%p153_p12, %s152_s4), 2 }
  0x1e   : > { %s485_s5 = sshll.u32 %s1007_s4, 3 }
  0x1f   : > { %s156_s6 = ssub.s32 16, %s485_s5 }
  0x20   : > { %s157_s7 = sshll.u32 %s156_s6, 4 }
  0x21   : > { %158 = vsyncadd %s849_s8, %s157_s7  ;;  %p852_p13 = scmp.ne.s32.totalorder %s485_s5, 0  ;;  %s507_s20 = sshll.u32 %s1003_s21, 4 }
  0x22   : > { %s161_s26 = scalar_lea.hbm %s982_s0, %s507_s20  ;;  %s860_s27 = sshll.u32 %s146_s9, 4  ;;  %s166_s27 = int_to_ptr.vmem [resolvable:$true] %s860_s27 }
  0x23   : > { %s163_s29 = sshll.u32 %s161_s26, 4  ;;  %s489_s30 = sshll.u32 %s1007_s4, 7  ;;  %s863_s29 = int_to_ptr.hbm [resolvable:$true] %s163_s29 }
  0x24   : > { %s600_s3 = sshra.s32 %s863_s29, 4  ;;  %s602_s5 = sshrl.u32 %s489_s30, 4  ;;  %s601_s3 = int_to_ptr.hbm [resolvable:$true] %s600_s3 }
  0x25   : > { %s607_s6 = scalar_lea.hbm %s601_s3, %s602_s5  ;;  %s611_s9 = scalar_lea.hbm %s982_s0, 56 }
  0x26   : > { %p608_p0 = scmp.ne.s32.totalorder %s601_s3, %s607_s6  ;;  %p613_p3 = scmp.lt.s32.totalorder %s611_s9, %s607_s6 }
  0x28   : > { %p609_p1 = pnand %p608_p0, %p852_p13 }
  0x2a   : > { %p610_p2 = pneg %p609_p1 }
  0x2c   : > { %p615_p4 = pnand %p613_p3, %p610_p2 }
  0x2e   : > { %618 = shalt.err (!%p615_p4)
}
  0x2f   : > { %s619_s22 = sshra.s32 %s166_s27, 4  ;;  %s750_s26 = smov [#allocation3]   ;;  %s620_s22 = int_to_ptr.vmem [resolvable:$true] %s619_s22 }
  0x30   : > { %s626_s24 = scalar_lea.vmem %s620_s22, %s602_s5  ;;  %s630_s3 = scalar_lea.vmem %s750_s26, 32 }
  0x31   : > { %p627_p5 = scmp.ne.s32.totalorder %s620_s22, %s626_s24  ;;  %p632_p10 = scmp.lt.s32.totalorder %s630_s3, %s626_s24 }
  0x33   : > { %p628_p7 = pnand %p627_p5, %p852_p13 }
  0x35   : > { %p629_p8 = pneg %p628_p7 }
  0x37   : > { %p634_p11 = pnand %p632_p10, %p629_p8 }
  0x39   : > { %637 = shalt.err (!%p634_p11)
}
  0x3a   : > { %s751_s7 = smov 128   ;;  %s752_s6 = smov 8  }
  0x3b   : > { %171 = dma.hbm_to_vmem [thread:$0]  (%p852_p13), %s863_s29, %s489_s30, %s166_s27, %s849_s8, %s751_s7, %s751_s7, %s752_s6  }
  0x3c PF: > { %174 = sbr.rel (!%p827_p6) target bundleno = 96 (0x60), region = 24  ;;  %s175_s5 = sand.u32 (%p827_p6), 1, %s728_s11  }
  0x3d   : > { %s492_s20 = sshll.u32 (%p827_p6), %s1003_s21, 1  ;;  %s490_s9 = sshll.u32 (%p827_p6), %s175_s5, 4 }
  0x3e   : > { %s185_s22 = ssub.s32 (%p827_p6), 7, %s492_s20  ;;  %s893_s3 = scalar_lea.sflag (%p827_p6), [#allocation6], %s175_s5 }
  0x3f   : > { %p186_p12 = scmp.lt.s32.totalorder (%p827_p6), %s185_s22, 2  ;;  %s179_s4 = scalar_lea.vmem (%p827_p6), [#allocation5], %s490_s9 }
  0x41   : > { %s1009_s22 = smov (!%p186_p12, %s185_s22), 2 }
  0x42   : > { %s493_s24 = sshll.u32 %s1009_s22, 3 }
  0x43   : > { %s189_s26 = ssub.s32 16, %s493_s24 }
  0x44   : > { %s190_s19 = sshll.u32 %s189_s26, 4 }
  0x45   : > { %191 = vsyncadd %s893_s3, %s190_s19  ;;  %p896_p6 = scmp.ne.s32.totalorder %s493_s24, 0  ;;  %s508_s8 = sshll.u32 %s1003_s21, 4 }
  0x46   : > { %s194_s30 = scalar_lea.hbm %s983_s1, %s508_s8  ;;  %s904_s7 = sshll.u32 %s179_s4, 4  ;;  %s199_s7 = int_to_ptr.vmem [resolvable:$true] %s904_s7 }
  0x47   : > { %s196_s6 = sshll.u32 %s194_s30, 4  ;;  %s497_s5 = sshll.u32 %s1009_s22, 7  ;;  %s907_s6 = int_to_ptr.hbm [resolvable:$true] %s196_s6 }
  0x48   : > { %s639_s20 = sshra.s32 %s907_s6, 4  ;;  %s641_s9 = sshrl.u32 %s497_s5, 4  ;;  %s640_s20 = int_to_ptr.hbm [resolvable:$true] %s639_s20 }
  0x49   : > { %s646_s24 = scalar_lea.hbm %s640_s20, %s641_s9  ;;  %s650_s19 = scalar_lea.hbm %s983_s1, 56 }
  0x4a   : > { %p647_p13 = scmp.ne.s32.totalorder %s640_s20, %s646_s24  ;;  %p652_p2 = scmp.lt.s32.totalorder %s650_s19, %s646_s24 }
  0x4c   : > { %p648_p0 = pnand %p647_p13, %p896_p6 }
  0x4e   : > { %p649_p1 = pneg %p648_p0 }
  0x50   : > { %p654_p3 = pnand %p652_p2, %p649_p1 }
  0x52   : > { %657 = shalt.err (!%p654_p3)
}
  0x53   : > { %s658_s4 = sshra.s32 %s199_s7, 4  ;;  %s753_s27 = smov [#allocation5]   ;;  %s659_s4 = int_to_ptr.vmem [resolvable:$true] %s658_s4 }
  0x54   : > { %s665_s8 = scalar_lea.vmem %s659_s4, %s641_s9  ;;  %s669_s29 = scalar_lea.vmem %s753_s27, 32 }
  0x55   : > { %p666_p4 = scmp.ne.s32.totalorder %s659_s4, %s665_s8  ;;  %p671_p8 = scmp.lt.s32.totalorder %s669_s29, %s665_s8 }
  0x57   : > { %p667_p5 = pnand %p666_p4, %p896_p6 }
  0x59   : > { %p668_p7 = pneg %p667_p5 }
  0x5b   : > { %p673_p10 = pnand %p671_p8, %p668_p7 }
  0x5d   : > { %676 = shalt.err (!%p673_p10)
}
  0x5e   : > { %s754_s30 = smov 128   ;;  %s755_s20 = smov 8  }
  0x5f   : > { %204 = dma.hbm_to_vmem [thread:$0]  (%p896_p6), %s907_s6, %s497_s5, %s199_s7, %s893_s3, %s754_s30, %s754_s30, %s755_s20  }
  0x60 PF: > { %p498_p11 = scmp.ge.s32.totalorder %s748_s16, 1  ;;  %p206_p12 = scmp.lt.s32.totalorder %s748_s16, 5 }
  0x62   : > { %p207_p13 = pnand %p498_p11, %p206_p12 }
  0x63   : > { %s212_s9 = sand.u32 (!%p207_p13), 1, %s724_s10  }
  0x64   : > { %210 = sbr.rel (%p207_p13) target bundleno = 549 (0x225), region = 28  ;;  %s499_s24 = sshll.u32 (!%p207_p13), %s212_s9, 4 }
  0x65   : > { %s213_s21 = scalar_lea.sflag (!%p207_p13), [#allocation4], %s212_s9  ;;  %s216_s26 = scalar_lea.vmem (!%p207_p13), [#allocation3], %s499_s24 }
  0x69   : > { %711 = dma.done.wait (%p832_p9), %s213_s21, 256  }
  0x6a   : > { %713 = vsyncadd (%p832_p9), %s213_s21, 4294967040  ;;  %s223_s22 = scalar_lea.sflag [#allocation6], %s212_s9  ;;  %s226_s3 = scalar_lea.vmem [#allocation5], %s499_s24 }
  0x6b   : > { %715 = dma.done.wait (%p832_p9), %s223_s22, 256  }
  0x6c   : > { %717 = vsyncadd (%p832_p9), %s223_s22, 4294967040  ;;  %p269_p6 = scmp.lt.s32.totalorder %s736_s13, 1  ;;  %p501_p0 = scmp.ne.s32.totalorder %s732_s12, 0 }
  0x6e   : > { %s943_s23 = scalar_select %p269_p6, %s736_s13, 1 }
  0x6f   : > { %275 = sbr.rel (%p501_p0) target bundleno = 118 (0x76), region = 40 }
  0x70   : > { %s271_s5 = scalar_lea.vmem %s984_s2, %s943_s23 }
  0x74   : > { %vm276_vm0 = vcmask 0   ;;  %v756_v0 = vmov 0.0  }
  0x75   : > { %277 = vst.msk [vmem:[#allocation2] sm:$0x1] %vm276_vm0, %v756_v0 }
  0x76 PF: > { %v280_v1 = vld [vmem:[%s226_s3] sm:$0xff]  ;;  %v281_v3 = vld [vmem:[%s226_s3 + $0x8] sm:$0xff]  ;;  %s502_s25 = sshll.u32 %s736_s13, 1  ;;  %v353_v59 = vlaneseq  ;;  %vm372_vm3 = vcmask 0   ;;  %p504_p9 = scmp.ne.s32.totalorder %s732_s12, 1 }
  0x77   : > { %v278_v2 = vld [vmem:[%s216_s26] sm:$0xff]  ;;  %308 = vmax.xlane.f32.xlu1 %v280_v1  ;;  %v279_v4 = vld [vmem:[%s216_s26 + $0x8] sm:$0xff]  ;;  %s351_s19 = sadd.s32 %s732_s12, %s502_s25 }
  0x78   : > { %282 = vmax.xlane.f32.xlu0 %v278_v2  ;;  %s503_s4 = sshll.u32 %s351_s19, 4  ;;  %v354_v60 = vshrl.u32 %v353_v59, 7 }
  0x79   : > { %v356_v62 = vstv %s503_s4 }
  0x7a   : > { %v355_v61 = vadd.s32 8, %v354_v60  ;;  %v357_v63 = vadd.s32 %v356_v62, %v354_v60 }
  0x7c   : > { %vm359_vm1 = vcmp.lt.s32.totalorder %v357_v63, 52 }
  0x7f   : > { %310 = vmax.xlane.f32.xlu1 %v281_v3 }
  0x80   : > { %284 = vmax.xlane.f32.xlu0 %v279_v4 }
  0xea   : > { %v309_v5 = vpop.xlane.xlu1 %308 }
  0xeb   : > { %v283_v6 = vpop.xlane.xlu0 %282  ;;  %v312_v7 = vsub.f32 %v280_v1, %v309_v5  ;;  %v358_v1 = vadd.s32 %v356_v62, %v355_v61 }
  0xec   : > { %v286_v8 = vsub.f32 %v278_v2, %v283_v6 }
  0xed   : > { %v314_v9 = vmul.f32 0.25, %v312_v7  ;;  %vm360_vm2 = vcmp.lt.s32.totalorder %v358_v1, 52 }
  0xee   : > { %v288_v10 = vmul.f32 0.25, %v286_v8 }
  0xef   : > { %v316_v11 = vmul.f32 1.442695, %v314_v9 }
  0xf0   : > { %v290_v12 = vmul.f32 1.442695, %v288_v10 }
  0xf1   : > { %580 = vpow2.f32 %v316_v11 }
  0xf2   : > { %582 = vpow2.f32 %v290_v12  ;;  %v311_v13 = vpop.xlane.xlu1 %310 }
  0xf3   : > { %v285_v14 = vpop.xlane.xlu0 %284  ;;  %v313_v15 = vsub.f32 %v281_v3, %v311_v13  ;;  %v363_v13 = vld [vmem:[#allocation2] sm:$0x1] }
  0xf4   : > { %v287_v16 = vsub.f32 %v279_v4, %v285_v14 }
  0xf5   : > { %v315_v17 = vmul.f32 0.25, %v313_v15 }
  0xf6   : > { %v289_v18 = vmul.f32 0.25, %v287_v16 }
  0xf7   : > { %v581_v19 = vpop.eup %580  ;;  %v318_v20 = vmul.f32 1.442695, %v315_v17 }
  0xf8   : > { %v292_v21 = vmul.f32 1.442695, %v289_v18  ;;  %v583_v22 = vpop.eup %582  ;;  %320 = vadd.xlane.f32.xlu0 %v581_v19 }
  0xf9   : > { %584 = vpow2.f32 %v318_v20  ;;  %294 = vadd.xlane.f32.xlu2 %v583_v22 }
  0xfa   : > { %586 = vpow2.f32 %v292_v21 }
  0xff   : > { %v585_v23 = vpop.eup %584 }
 0x100   : > { %v587_v24 = vpop.eup %586  ;;  %322 = vadd.xlane.f32.xlu1 %v585_v23 }
 0x101   : > { %296 = vadd.xlane.f32.xlu2 %v587_v24 }
 0x16b   : > { %v321_v26 = vpop.xlane.xlu0 %320 }
 0x16c   : > { %v295_v25 = vpop.xlane.xlu2 %294 }
 0x16d   : > { %588 = vrcp.f32 %v295_v25 }
 0x16e   : > { %590 = vrcp.f32 %v321_v26 }
 0x173   : > { %v589_v27 = vpop.eup %588  ;;  %v323_v31 = vpop.xlane.xlu1 %322 }
 0x174   : > { %v300_v28 = vmul.f32 %v589_v27, %v295_v25  ;;  %v297_v29 = vpop.xlane.xlu2 %296  ;;  %v591_v32 = vpop.eup %590 }
 0x175   : > { %592 = vrcp.f32 %v297_v29  ;;  %v326_v36 = vmul.f32 %v591_v32, %v321_v26 }
 0x176   : > { %v302_v30 = vsub.f32 2.0, %v300_v28  ;;  %594 = vrcp.f32 %v323_v31 }
 0x177   : > { %v328_v41 = vsub.f32 2.0, %v326_v36 }
 0x178   : > { %v304_v33 = vmul.f32 %v589_v27, %v302_v30 }
 0x179   : > { %v330_v45 = vmul.f32 %v591_v32, %v328_v41 }
 0x17a   : > { %v306_v34 = vmul.f32 %v583_v22, %v304_v33 }
 0x17b   : > { %v593_v35 = vpop.eup %592  ;;  %v332_v51 = vmul.f32 %v581_v19, %v330_v45 }
 0x17c   : > { %v301_v37 = vmul.f32 %v593_v35, %v297_v29  ;;  %v334_v38 = vadd.f32 7.8125e-08, %v306_v34  ;;  %v595_v42 = vpop.eup %594 }
 0x17d   : > { %v327_v46 = vmul.f32 %v595_v42, %v323_v31 }
 0x17e   : > { %v303_v39 = vsub.f32 2.0, %v301_v37  ;;  %v336_v40 = vmul.f32 0.99999, %v334_v38 }
 0x17f   : > { %v329_v50 = vsub.f32 2.0, %v327_v46 }
 0x180   : > { %v305_v43 = vmul.f32 %v593_v35, %v303_v39  ;;  %596 = vlog2.f32 %v336_v40 }
 0x181   : > { %v331_v54 = vmul.f32 %v595_v42, %v329_v50 }
 0x182   : > { %v307_v44 = vmul.f32 %v587_v24, %v305_v43 }
 0x183   : > { %v333_v56 = vmul.f32 %v585_v23, %v331_v54 }
 0x184   : > { %v335_v47 = vadd.f32 7.8125e-08, %v307_v44 }
 0x186   : > { %v597_v48 = vpop.eup %596  ;;  %v337_v49 = vmul.f32 0.99999, %v335_v47 }
 0x187   : > { %v339_v52 = vmul.f32 0.6931472, %v597_v48 }
 0x188   : > { %598 = vlog2.f32 %v337_v49 }
 0x189   : > { %v342_v53 = vmul.f32 %v339_v52, %v332_v51 }
 0x18b   : > { %344 = vadd.xlane.f32.xlu2 %v342_v53 }
 0x18e   : > { %v599_v55 = vpop.eup %598 }
 0x18f   : > { %v341_v57 = vmul.f32 0.6931472, %v599_v55 }
 0x191   : > { %v343_v58 = vmul.f32 %v341_v57, %v333_v56 }
 0x193   : > { %346 = vadd.xlane.f32.xlu0 %v343_v58 }
 0x1fe   : > { %v345_v0 = vpop.xlane.xlu2 %344 }
 0x1ff   : > { %v348_v2 = vsub.f32 0.0, %v345_v0 }
 0x201   : > { %v361_v5 = vsel %vm359_vm1, %v348_v2, 0.0 }
 0x206   : > { %v347_v3 = vpop.xlane.xlu0 %346 }
 0x207   : > { %v349_v4 = vsub.f32 0.0, %v347_v3 }
 0x209   : > { %v362_v6 = vsel %vm360_vm2, %v349_v4, 0.0 }
 0x20a   : > { %v364_v7 = vadd.f32 %v362_v6, %v361_v5 }
 0x20c   : > { %v365_v8 = vrot.slane %v364_v7, 4 }
 0x20e   : > { %v366_v9 = vadd.f32 %v365_v8, %v364_v7 }
 0x210   : > { %v367_v10 = vrot.slane %v366_v9, 2 }
 0x212   : > { %v368_v11 = vadd.f32 %v367_v10, %v366_v9 }
 0x214   : > { %v369_v12 = vrot.slane %v368_v11, 1 }
 0x216   : > { %v370_v14 = vadd.f32 %v369_v12, %v368_v11  ;;  %377 = sbr.rel (%p504_p9) target bundleno = 549 (0x225), region = 44 }
 0x218   : > { %v371_v15 = vadd.f32 %v370_v14, %v363_v13 }
 0x21a   : > { %373 = vst.msk [vmem:[#allocation2] sm:$0x1] %vm372_vm3, %v371_v15 }
 0x221   : > { %v378_v16 = vld [vmem:[#allocation2] sm:$0x1] }
 0x222   : > { %v379_v17 = vmul.f32 0.009615385, %v378_v16 }
 0x224   : > { %380 = vst.msk [vmem:[%s271_s5] sm:$0x1] %vm372_vm3, %v379_v17 }
 0x225 PF: > { %s18_s16 = sadd.s32 1, %s748_s16   ;;  %s989_s9 = smov %s724_s10 }
 0x226   : > { %p15_p1 = scmp.ge.s32.totalorder %s18_s16, 6   ;;  %s990_s10 = smov %s728_s11 }
 0x227   : > { %s991_s11 = smov %s839_s28  ;;  %s992_s12 = smov %s740_s14 }
 0x228   : > { %s993_s13 = smov %s744_s15  ;;  %s994_s14 = smov %s997_s17 }
 0x229   : > { %s995_s15 = smov %s1001_s18  ;;  %17 = sbr.rel (!%p15_p1) target bundleno = 7 (0x7), region = 89 }
 0x22e   :  { %398 = vsyncpa [#allocation4], 1 }
 0x22f   :  { %400 = vsyncpa [#allocation4 + $0x1], 1 }
 0x230   :  { %401 = vsyncpa [#allocation6], 1 }
 0x231   :  { %403 = vsyncpa [#allocation6 + $0x1], 1 }

</bundles_post_ra>
